<compile_context>
chip_gen: v7x
topology: tpu7x:2x2x1
jax: 0.10.0
libtpu: 0.0.40
codegen_flags: <defaults>
</compile_context>

<pallas_src>
import jax
import jax.numpy as jnp
from jax import lax
from jax.experimental import pallas as pl
from jax.experimental.pallas import tpu as pltpu


def _make_seg_hist_kernel(n, tile_pix, npix, n_blocks, blocks_per_split, needs_clamp):
    """Grid = (B, S, blocks_per_split). Output block is a resident (n, n) accumulator."""

    def kernel(logits_ref, target_ref, hist_ref):
        s = pl.program_id(1)
        p = pl.program_id(2)

        # Reset the per-(batch, split) confusion-matrix accumulator.
        @pl.when(p == 0)
        def _():
            hist_ref[...] = jnp.zeros_like(hist_ref)

        logits = logits_ref[0]                          # (C, tile_pix), source dtype
        labels = target_ref[0]                          # (1, tile_pix) int32
        C = logits.shape[0]

        # argmax over classes: ties -> smallest index; NaN counts as the max
        # (torch.argmax treats NaN as greater than everything -> first NaN wins).
        max_val = jnp.max(logits, axis=0, keepdims=True)                    # (1, tp)
        class_ids = lax.broadcasted_iota(jnp.int32, (C, tile_pix), 0)       # (C, tp)
        is_max = (logits == max_val) | jnp.isnan(logits)
        pred_idx = jnp.min(jnp.where(is_max, class_ids, C),
                           axis=0, keepdims=True)                           # (1, tp)

        # Mask pixels past the end of the (un-padded) image -- the ragged last
        # block is read without a wrapper-side pad, so its tail lanes are garbage.
        lane = lax.broadcasted_iota(jnp.int32, (1, tile_pix), 1)
        logical_blk = s * blocks_per_split + p
        valid = (logical_blk * tile_pix + lane) < npix
        if needs_clamp:
            # Uneven split: extra iterations re-read the last block; mask them out.
            valid = valid & (logical_blk < n_blocks)
        labels = jnp.where(valid, labels, -1)

        # 0/1 values are exact in bf16; bf16 operands -> fewer MXU passes than f32.
        cls_iota = (class_ids if n == C
                    else lax.broadcasted_iota(jnp.int32, (n, tile_pix), 0))
        onehot_pred = (pred_idx == cls_iota).astype(jnp.bfloat16)           # (n, tp)
        # Labels outside [0, n) (including masked pixels at -1) match no row ->
        # they contribute nothing, exactly like the (label>=0)&(label<n) filter.
        onehot_label = (labels == cls_iota).astype(jnp.bfloat16)            # (n, tp)

        # hist[i, j] += sum_p onehot_label[i, p] * onehot_pred[j, p]   (MXU matmul)
        hist_ref[0, 0] += lax.dot_general(
            onehot_label, onehot_pred,
            dimension_numbers=(((1,), (1,)), ((), ())),
            preferred_element_type=jnp.float32)

    return kernel


def _vmem_capacity_bytes():
    try:
        return int(pltpu.get_tpu_info().vmem_capacity_bytes)
    except Exception:
        return 64 * 1024 * 1024  # conservative fallback: v7x per-core VMEM


def _pick_tile_pix(C, n, npix, logit_bytes, requested, vmem_budget_bytes):
    """Largest lane tile (multiple of 128) fitting a conservative VMEM estimate."""
    # double-buffered logits + label blocks, bf16 one-hots, iotas / argmax temps
    per_pix = 2 * (C * logit_bytes + 4) + 4 * n + 8 * C + 16
    cap = max(128, (vmem_budget_bytes // per_pix) // 128 * 128)
    tp = min(int(requested), cap)
    tp = min(tp, max(128, pl.cdiv(npix, 128) * 128))   # no point exceeding the image
    return max(128, (tp // 128) * 128)


def seg_iou_metric(logits, target, num_classes, tile_pix=None, pixel_splits=None):
    """logits: (B, C, H, W) float; target: (B, H, W) int. Returns (B, num_classes) f32."""
    B, C, H, W = logits.shape
    n = num_classes
    npix = H * W
    logit_bytes = jnp.dtype(logits.dtype).itemsize

    # Generation-aware VMEM budgeting: v7x has 64 MiB/core, v5e/v6e have 128 MiB.
    vmem_cap = _vmem_capacity_bytes()
    vmem_budget = max(8 * 1024 * 1024, (vmem_cap * 3) // 8)    # ~24 MiB v7x / 48 MiB v6e
    vmem_limit = min(vmem_cap // 2, 64 * 1024 * 1024)          # 32 MiB v7x / 64 MiB v6e

    if tile_pix is None:
        # Aim for ~4 MiB of logits HBM traffic per grid step (near HBM roofline);
        # the VMEM budget below trims this on v7x if needed.
        tile_pix = (4 * 1024 * 1024) // max(1, C * logit_bytes + 4)
        tile_pix = min(max(tile_pix, 1024), 32768)
    tp = _pick_tile_pix(C, n, npix, logit_bytes, tile_pix, vmem_budget)

    n_blocks = pl.cdiv(npix, tp)

    if pixel_splits is None:
        # v7x megacore: with B == 1 the batch axis can't feed both TensorCores, so
        # shard the pixel axis instead. Harmless (serial) on single-TC chips.
        pixel_splits = 2 if B == 1 else 1
    S = max(1, min(int(pixel_splits), n_blocks))
    bps = pl.cdiv(n_blocks, S)
    needs_clamp = S * bps > n_blocks
    last_blk = n_blocks - 1

    # Free metadata reshapes -- NO padding copy of the logits through HBM.
    logits_flat = logits.reshape(B, C, npix)
    target_flat = target.reshape(B, 1, npix).astype(jnp.int32)

    def pix_block(s, p):
        blk = s * bps + p
        if needs_clamp:
            blk = jnp.minimum(blk, last_blk)   # never request a fully-OOB block
        return blk

    kernel = _make_seg_hist_kernel(n, tp, npix, n_blocks, bps, needs_clamp)

    hist = pl.pallas_call(
        kernel,
        out_shape=jax.ShapeDtypeStruct((B, S, n, n), jnp.float32),
        grid_spec=pltpu.PrefetchScalarGridSpec(
            num_scalar_prefetch=0,
            grid=(B, S, bps),
            in_specs=[
                pl.BlockSpec((1, C, tp), lambda b, s, p: (b, 0, pix_block(s, p))),
                pl.BlockSpec((1, 1, tp), lambda b, s, p: (b, 0, pix_block(s, p))),
            ],
            out_specs=pl.BlockSpec((1, 1, n, n), lambda b, s, p: (b, s, 0, 0)),
        ),
        compiler_params=pltpu.CompilerParams(
            dimension_semantics=("parallel", "parallel", "arbitrary"),
            vmem_limit_bytes=vmem_limit),
    )(logits_flat, target_flat)

    # Tiny epilogue over (B, S, n, n): merge split partial hists and compute IoU.
    hist = hist.sum(axis=1)                                       # (B, n, n) [label, pred]
    diag = jnp.diagonal(hist, axis1=1, axis2=2)                   # (B, n)
    union = jnp.maximum(hist.sum(axis=2) + hist.sum(axis=1) - diag, 1.0)
    return diag / union


def seg_iou_reference(logits, target, num_classes):
    """Pure-JAX reference mirroring the PyTorch module."""
    n = num_classes
    preds = jnp.argmax(logits, axis=1)
    B = preds.shape[0]
    ious = []
    for b in range(B):
        p = preds[b].reshape(-1)
        l = target[b].reshape(-1)
        valid = (l >= 0) & (l < n)
        idx = jnp.where(valid, n * l + p, n * n)      # invalid pixels -> extra bin
        hist = jnp.bincount(idx, length=n * n + 1)[: n * n].reshape(n, n)
        hist = hist.astype(jnp.float32)
        diag = jnp.diag(hist)
        union = jnp.maximum(hist.sum(axis=1) + hist.sum(axis=0) - diag, 1.0)
        ious.append(diag / union)
    return jnp.stack(ious)


if __name__ == "__main__":
    B, C, H, W = 2, 4, 16, 16          # num_classes == C
    num_classes = C

    key = jax.random.PRNGKey(0)
    k1, k2 = jax.random.split(key)
    logits = jax.random.normal(k1, (B, C, H, W), dtype=jnp.float32)
    # include some out-of-range labels (-1, 4, 5) to exercise the validity mask
    target = jax.random.randint(k2, (B, H, W), minval=-1, maxval=num_classes + 2,
                                dtype=jnp.int32)

    iou = seg_iou_metric(logits, target, num_classes)
    jax.block_until_ready(iou)

    ref = seg_iou_reference(logits, target, num_classes)
    assert iou.shape == (B, num_classes)
    assert jnp.allclose(iou, ref, atol=1e-6, rtol=1e-6), (iou, ref)
    print("KERNEL_OK")
</pallas_src>

<mosaic_0001>
module attributes {stable_mosaic.version = 11 : i64} {
  func.func @kernel(%arg0: i32, %arg1: i32, %arg2: i32, %arg3: memref<1x4x256xf32, #tpu.memory_space<vmem>>, %arg4: memref<1x1x256xi32, #tpu.memory_space<vmem>>, %arg5: memref<1x1x4x4xf32, #tpu.memory_space<vmem>>) attributes {dimension_semantics = [#tpu.dimension_semantics<parallel>, #tpu.dimension_semantics<parallel>, #tpu.dimension_semantics<arbitrary>], iteration_bounds = array<i64: 2, 1, 1>, scalar_prefetch = 0 : i64, scratch_operands = 0 : i64, tpu.core_type = #tpu.core_type<tc>, window_params = [{transform_indices = @transform_0, window_bounds = array<i64: 1, 4, 256>}, {transform_indices = @transform_1, window_bounds = array<i64: 1, 1, 256>}, {transform_indices = @transform_2, window_bounds = array<i64: 1, 1, 4, 4>}]} {
    %c0_i32 = arith.constant 0 : i32
    %0 = arith.cmpi eq, %arg2, %c0_i32 : i32
    %1 = arith.extui %0 : i1 to i32
    %c0_i32_0 = arith.constant 0 : i32
    %2 = arith.cmpi ne, %1, %c0_i32_0 : i32
    scf.if %2 {
      %cst_17 = arith.constant 0.000000e+00 : f32
      %45 = vector.broadcast %cst_17 : f32 to vector<1x1x4x4xf32>
      %c0_18 = arith.constant 0 : index
      %c0_19 = arith.constant 0 : index
      %c0_20 = arith.constant 0 : index
      %c0_21 = arith.constant 0 : index
      %46 = vector.load %arg5[%c0_18, %c0_19, %c0_20, %c0_21] : memref<1x1x4x4xf32, #tpu.memory_space<vmem>>, vector<1x1x4x4xf32>
      tpu.vector_store %arg5[%c0_18, %c0_19, %c0_20, %c0_21], %45 {strides = array<i32>} : memref<1x1x4x4xf32, #tpu.memory_space<vmem>>, vector<1x1x4x4xf32>,
    } else {
    }
    %c0 = arith.constant 0 : index
    %c0_1 = arith.constant 0 : index
    %c0_2 = arith.constant 0 : index
    %3 = vector.load %arg3[%c0, %c0_1, %c0_2] : memref<1x4x256xf32, #tpu.memory_space<vmem>>, vector<1x4x256xf32>
    %4 = vector.shape_cast %3 : vector<1x4x256xf32> to vector<4x256xf32>
    %c0_3 = arith.constant 0 : index
    %c0_4 = arith.constant 0 : index
    %c0_5 = arith.constant 0 : index
    %5 = vector.load %arg4[%c0_3, %c0_4, %c0_5] : memref<1x1x256xi32, #tpu.memory_space<vmem>>, vector<1x1x256xi32>
    %6 = vector.shape_cast %5 : vector<1x1x256xi32> to vector<1x256xi32>
    %cst = arith.constant dense<0xFF800000> : vector<256xf32>
    %7 = vector.multi_reduction <maximumf>, %4, %cst [0] : vector<4x256xf32> to vector<256xf32>
    %8 = vector.shape_cast %7 : vector<256xf32> to vector<1x256xf32>
    %9 = tpu.iota {dimensions = array<i32: 0>} : vector<4x256xi32>
    %10 = vector.broadcast %8 : vector<1x256xf32> to vector<4x256xf32>
    %11 = arith.cmpf oeq, %4, %10 : vector<4x256xf32>
    %12 = arith.cmpf one, %4, %4 : vector<4x256xf32>
    %13 = arith.ori %11, %12 : vector<4x256xi1>
    %c4_i32 = arith.constant 4 : i32
    %14 = vector.broadcast %c4_i32 : i32 to vector<4x256xi32>
    %15 = arith.select %13, %9, %14 : vector<4x256xi1>, vector<4x256xi32>
    %cst_6 = arith.constant dense<2147483647> : vector<256xi32>
    %16 = vector.multi_reduction <minsi>, %15, %cst_6 [0] : vector<4x256xi32> to vector<256xi32>
    %17 = vector.shape_cast %16 : vector<256xi32> to vector<1x256xi32>
    %18 = tpu.iota {dimensions = array<i32: 1>} : vector<1x256xi32>
    %c1_i32 = arith.constant 1 : i32
    %19 = arith.muli %arg1, %c1_i32 : i32
    %20 = arith.addi %19, %arg2 : i32
    %c256_i32 = arith.constant 256 : i32
    %21 = arith.muli %20, %c256_i32 : i32
    %22 = vector.broadcast %21 : i32 to vector<1x256xi32>
    %23 = arith.addi %22, %18 : vector<1x256xi32>
    %c256_i32_7 = arith.constant 256 : i32
    %24 = vector.broadcast %c256_i32_7 : i32 to vector<1x256xi32>
    %25 = arith.cmpi slt, %23, %24 : vector<1x256xi32>
    %c-1_i32 = arith.constant -1 : i32
    %26 = vector.broadcast %c-1_i32 : i32 to vector<1x256xi32>
    %27 = arith.select %25, %6, %26 : vector<1x256xi1>, vector<1x256xi32>
    %28 = vector.broadcast %17 : vector<1x256xi32> to vector<4x256xi32>
    %29 = arith.cmpi eq, %28, %9 : vector<4x256xi32>
    %30 = arith.extui %29 : vector<4x256xi1> to vector<4x256xi32>
    %31 = arith.sitofp %30 : vector<4x256xi32> to vector<4x256xf32>
    %32 = arith.truncf %31 : vector<4x256xf32> to vector<4x256xbf16>
    %33 = vector.broadcast %27 : vector<1x256xi32> to vector<4x256xi32>
    %34 = arith.cmpi eq, %33, %9 : vector<4x256xi32>
    %35 = arith.extui %34 : vector<4x256xi1> to vector<4x256xi32>
    %36 = arith.sitofp %35 : vector<4x256xi32> to vector<4x256xf32>
    %37 = arith.truncf %36 : vector<4x256xf32> to vector<4x256xbf16>
    %c0_8 = arith.constant 0 : index
    %c0_9 = arith.constant 0 : index
    %c0_10 = arith.constant 0 : index
    %c0_11 = arith.constant 0 : index
    %38 = vector.load %arg5[%c0_8, %c0_9, %c0_10, %c0_11] : memref<1x1x4x4xf32, #tpu.memory_space<vmem>>, vector<1x1x4x4xf32>
    %39 = vector.shape_cast %38 : vector<1x1x4x4xf32> to vector<4x4xf32>
    %cst_12 = arith.constant dense<0.000000e+00> : vector<4x4xf32>
    %40 = tpu.matmul %37, %32, %cst_12 {dimension_numbers = #tpu.dot_dimension_numbers<[1], [1], [0], [0], [0, 0, 1, 0], [], []>} : vector<4x256xbf16>, vector<4x256xbf16>, vector<4x4xf32> -> vector<4x4xf32>
    %41 = arith.addf %39, %40 : vector<4x4xf32>
    %c0_13 = arith.constant 0 : index
    %c0_14 = arith.constant 0 : index
    %c0_15 = arith.constant 0 : index
    %c0_16 = arith.constant 0 : index
    %42 = vector.load %arg5[%c0_13, %c0_14, %c0_15, %c0_16] : memref<1x1x4x4xf32, #tpu.memory_space<vmem>>, vector<1x1x4x4xf32>
    %43 = vector.shape_cast %42 : vector<1x1x4x4xf32> to vector<4x4xf32>
    %44 = vector.shape_cast %41 : vector<4x4xf32> to vector<1x1x4x4xf32>
    tpu.vector_store %arg5[%c0_13, %c0_14, %c0_15, %c0_16], %44 {strides = array<i32>} : memref<1x1x4x4xf32, #tpu.memory_space<vmem>>, vector<1x1x4x4xf32>,
    return
  }
  func.func @transform_0(%arg0: i32, %arg1: i32, %arg2: i32) -> (i32, i32, i32) {
    %c1_i32 = arith.constant 1 : i32
    %0 = arith.muli %arg1, %c1_i32 : i32
    %1 = arith.addi %0, %arg2 : i32
    %c0_i32 = arith.constant 0 : i32
    %c0_i32_0 = arith.constant 0 : i32
    return %arg0, %c0_i32, %1 : i32, i32, i32
  }
  func.func @transform_1(%arg0: i32, %arg1: i32, %arg2: i32) -> (i32, i32, i32) {
    %c1_i32 = arith.constant 1 : i32
    %0 = arith.muli %arg1, %c1_i32 : i32
    %1 = arith.addi %0, %arg2 : i32
    %c0_i32 = arith.constant 0 : i32
    %c0_i32_0 = arith.constant 0 : i32
    return %arg0, %c0_i32, %1 : i32, i32, i32
  }
  func.func @transform_2(%arg0: i32, %arg1: i32, %arg2: i32) -> (i32, i32, i32, i32) {
    %c0_i32 = arith.constant 0 : i32
    %c0_i32_0 = arith.constant 0 : i32
    %c0_i32_1 = arith.constant 0 : i32
    return %arg0, %arg1, %c0_i32, %c0_i32_0 : i32, i32, i32, i32
  }
}

</mosaic_0001>

<bundles_post_ra>
// kernel: tpu_custom_call.1
= control target key start
LH: loop header
LB: loop body
LE: loop exit
PB: predicated region body
PF: predicated region fallthrough
CT: control target
= control target key end

     0   :  { %7 = vsyncpa [#allocation3], 0  ;;  %s1028_s0 = inlined_call_operand.hbm [shape: f32[2,4,256], index: 0, kind: input, shape index: {}]   ;;  %s1029_s1 = inlined_call_operand.hbm [shape: s32[2,1,256], index: 1, kind: input, shape index: {}]   ;;  %s1030_s2 = inlined_call_operand.hbm [shape: f32[2,1,4,4], index: 2, kind: output, shape index: {}]  }
   0x1   :  { %9 = vsyncpa [#allocation3 + $0x1], 0 }
   0x2   :  { %10 = vsyncpa [#allocation6], 0 }
   0x3   :  { %12 = vsyncpa [#allocation6 + $0x1], 0 }
   0x4   :  { %13 = vsyncpa [#allocation4], 0 }
   0x5   :  { %15 = vsyncpa [#allocation4 + $0x1], 0  ;;  %s790_s9 = smov 0   ;;  %s792_s10 = smov 0  }
   0x6   :  { %s794_s11 = smov 0   ;;  %s796_s12 = smov 0  }
   0x7   :  { %s798_s13 = smov 0   ;;  %s800_s14 = smov 0  }
   0x8 LB: > { %s518_s15 = sadd.s32 4294967295, %s767_s14   ;;  %s519_s16 = sadd.s32 4294967294, %s767_s14   ;;  %s767_s14 = sphi %s800_s14, %s21_s14   ;;  %s763_s13 = sphi %s798_s13, %s1050_s13   ;;  %s759_s12 = sphi %s796_s12, %s1049_s12   ;;  %s755_s11 = sphi %s794_s11, %s1048_s11   ;;  %s751_s10 = sphi %s792_s10, %s1047_s10   ;;  %s747_s9 = sphi %s790_s9, %s1046_s9  }
   0x9   : > { %s40_s17 = sadd.s32 1, %s763_s13  ;;  %s51_s18 = sadd.s32 1, %s755_s11 }
   0xa   : > { %p42_p0 = scmp.ge.s32.totalorder %s40_s17, 2  ;;  %p58_p1 = scmp.ne.s32.totalorder %s755_s11, %s751_s10 }
   0xb   : > { %p59_p2 = scmp.eq.s32.totalorder %s767_s14, 0  ;;  %p64_p3 = scmp.ne.s32.totalorder %s751_s10, %s747_s9 }
   0xc   : > { %s1052_s17 = smov (%p42_p0, %s40_s17), 0  ;;  %p65_p5 = scmp.eq.s32.totalorder %s518_s15, 0 }
   0xd   : > { %p831_p4 = por %p59_p2, %p58_p1  ;;  %s46_s20 = ssub.s32 %s763_s13, %s1052_s17 }
   0xe   : > { %p120_p6 = scmp.eq.s32.totalorder %s518_s15, 1  ;;  %p49_p7 = scmp.eq.s32.totalorder %s46_s20, 0 }
   0xf   : > { %p837_p8 = por %p65_p5, %p64_p3  ;;  %p126_p10 = scmp.eq.s32.totalorder %s519_s16, 1 }
  0x10   : > { %p841_p9 = por %p120_p6, %p58_p1  ;;  %p567_p13 = scmp.lt.s32.totalorder %s767_s14, 2 }
  0x11   : > { %s1034_s21 = scalar_select %p837_p8, 1, 0 }
  0x12   : > { %s1035_s22 = scalar_select %p841_p9, 1, 0 }
  0x13   : > { %s846_s23 = scalar_select %p49_p7, %s755_s11, %s51_s18  }
  0x14   : > { %p848_p11 = por %p126_p10, %p64_p3  ;;  %s855_s25 = sand.u32 1, %s755_s11  }
  0x15   : > { %s522_s26 = sshll.u32 %s855_s25, 3  ;;  %s548_s27 = sshll.u32 %s763_s13, 7 }
  0x16   : > { %s1036_s24 = scalar_select %p848_p11, 1, 0 }
  0x17   : > { %s862_s30 = scalar_lea.hbm %s1028_s0, %s548_s27  ;;  %s150_s3 = scalar_lea.vmem [#allocation2], %s522_s26 }
  0x18   : > { %s161_s4 = sshll.u32 %s150_s3, 4  ;;  %p868_p0 = pnand %p567_p13, %p831_p4  ;;  %s864_s4 = int_to_ptr.vmem [resolvable:$true] %s161_s4 }
  0x19   : > { %s147_s6 = scalar_lea.sflag [#allocation3], %s855_s25  ;;  %s621_s7 = scalar_lea.hbm %s862_s30, 128 }
  0x1a   : > { %p622_p3 = scmp.ne.s32.totalorder %s862_s30, %s621_s7  ;;  %p623_p5 = pneg %p868_p0 }
  0x1b   : > { %s626_s16 = scalar_lea.hbm %s1028_s0, 256  ;;  %p627_p4 = scmp.lt.u32.totalorder %s862_s30, %s1028_s0 }
  0x1c   : > { %p624_p6 = pnand %p623_p5, %p622_p3  ;;  %p628_p10 = scmp.lt.u32.totalorder %s626_s16, %s621_s7 }
  0x1d   : > { %p630_p12 = scmp.lt.u32.totalorder %s621_s7, %s862_s30 }
  0x1e   : > { %p625_p7 = pneg %p624_p6  ;;  %p629_p13 = por %p628_p10, %p627_p4 }
  0x20   : > { %p631_p1 = por %p630_p12, %p629_p13 }
  0x22   : > { %p632_p2 = pnand %p631_p1, %p625_p7 }
  0x24   : > { %635 = shalt.err (!%p632_p2)
}
  0x25   : > { %s636_s20 = scalar_lea.vmem %s864_s4, 128  ;;  %s769_s26 = smov [#allocation2]  }
  0x26   : > { %p637_p3 = scmp.ne.s32.totalorder %s864_s4, %s636_s20  ;;  %s641_s27 = sshll.u32 %s769_s26, 4  ;;  %s642_s27 = int_to_ptr.vmem [resolvable:$false] %s641_s27 }
  0x27   : > { %s643_s28 = scalar_lea.vmem %s642_s27, 256  ;;  %p644_p9 = scmp.lt.s32.totalorder %s864_s4, %s642_s27 }
  0x28   : > { %p639_p6 = pnand %p637_p3, %p623_p5  ;;  %p645_p4 = scmp.lt.s32.totalorder %s643_s28, %s636_s20 }
  0x2a   : > { %p640_p11 = pneg %p639_p6  ;;  %p646_p10 = por %p645_p4, %p644_p9 }
  0x2c   : > { %p647_p12 = pnand %p646_p10, %p640_p11 }
  0x2e   : > { %650 = shalt.err (!%p647_p12)
}
  0x2f   : > { %559 = dma.hbm_to_vmem [thread:$0]  (!%p868_p0), %s862_s30, 128, %s864_s4, %s147_s6  }
  0x30   : > { %p1038_p1 = scmp.lt.s32.totalorder %s767_s14, 3  ;;  %p1039_p2 = scmp.ge.s32.totalorder %s767_s14, 1 }
  0x31   : > { %s525_s3 = sshll.u32 %s855_s25, 1  ;;  %s549_s7 = sshll.u32 %s763_s13, 5 }
  0x32   : > { %p904_p7 = pnand %p1039_p2, %p1038_p1  ;;  %s913_s16 = scalar_lea.hbm %s1029_s1, %s549_s7 }
  0x33   : > { %s172_s18 = scalar_lea.vmem [#allocation5], %s525_s3  ;;  %s169_s30 = scalar_lea.sflag [#allocation6], %s855_s25 }
  0x34   : > { %s1040_s29 = scalar_select %p904_p7, 1, 0 }
  0x35   : > { %s183_s19 = sshll.u32 %s172_s18, 4  ;;  %s651_s4 = scalar_lea.hbm %s913_s16, 32  ;;  %s184_s19 = int_to_ptr.vmem [resolvable:$true] %s183_s19 }
  0x36   : > { %p652_p9 = scmp.ne.s32.totalorder %s913_s16, %s651_s4  ;;  %s656_s26 = scalar_lea.hbm %s1029_s1, 64 }
  0x37   : > { %p657_p3 = scmp.lt.u32.totalorder %s913_s16, %s1029_s1  ;;  %p658_p6 = scmp.lt.u32.totalorder %s656_s26, %s651_s4 }
  0x38   : > { %p654_p11 = pnand %p652_p9, %p623_p5  ;;  %p660_p10 = scmp.lt.u32.totalorder %s651_s4, %s913_s16 }
  0x39   : > { %p659_p4 = por %p658_p6, %p657_p3 }
  0x3a   : > { %p655_p13 = pneg %p654_p11 }
  0x3b   : > { %p661_p12 = por %p660_p10, %p659_p4 }
  0x3d   : > { %p662_p1 = pnand %p661_p12, %p655_p13 }
  0x3f   : > { %665 = shalt.err (!%p662_p1)
}
  0x40   : > { %s666_s25 = scalar_lea.vmem %s184_s19, 32  ;;  %s770_s3 = smov [#allocation5]  }
  0x41   : > { %p667_p2 = scmp.ne.s32.totalorder %s184_s19, %s666_s25  ;;  %s671_s7 = sshll.u32 %s770_s3, 4  ;;  %s672_s7 = int_to_ptr.vmem [resolvable:$false] %s671_s7 }
  0x42   : > { %s673_s8 = scalar_lea.vmem %s672_s7, 64  ;;  %p674_p8 = scmp.lt.s32.totalorder %s184_s19, %s672_s7 }
  0x43   : > { %p669_p9 = pnand %p667_p2, %p623_p5  ;;  %p675_p7 = scmp.lt.s32.totalorder %s673_s8, %s666_s25 }
  0x45   : > { %p670_p11 = pneg %p669_p9  ;;  %p676_p3 = por %p675_p7, %p674_p8 }
  0x47   : > { %p677_p6 = pnand %p676_p3, %p670_p11 }
  0x49   : > { %680 = shalt.err (!%p677_p6)
}
  0x4a   : > { %562 = dma.hbm_to_vmem [thread:$0]  (!%p868_p0), %s913_s16, 32, %s184_s19, %s169_s30  }
  0x4b   : > { %p1041_p13 = scmp.ne.s32.totalorder %s1040_s29, 0 }
  0x4c   : > { %s938_s15 = sand.u32 (!%p1041_p13), 1, %s751_s10   ;;  %p1042_p5 = scmp.ne.s32.totalorder (!%p1041_p13), %s1034_s21, 0 }
  0x4d   : > { %192 = sbr.rel (%p1041_p13) target bundleno = 362 (0x16a), region = 28  ;;  %s529_s18 = sshll.u32 (!%p1041_p13), %s938_s15, 3 }
  0x4e   : > { %s195_s4 = scalar_lea.sflag (!%p1041_p13), [#allocation3], %s938_s15  ;;  %s198_s6 = scalar_lea.vmem (!%p1041_p13), [#allocation2], %s529_s18 }
  0x54   : > { %734 = dma.done.wait (%p1042_p5), %s195_s4, 128  }
  0x55   : > { %736 = vsyncadd (%p1042_p5), %s195_s4, 4294967168  ;;  %s530_s5 = sshll.u32 %s938_s15, 1  ;;  %s204_s29 = scalar_lea.sflag [#allocation6], %s938_s15 }
  0x56   : > { %s207_s16 = scalar_lea.vmem [#allocation5], %s530_s5 }
  0x57   : > { %738 = dma.done.wait (%p1042_p5), %s204_s29, 32  }
  0x58   : > { %740 = vsyncadd (%p1042_p5), %s204_s29, 4294967264  ;;  %v264_v0 = vlaneseq  ;;  %s531_s19 = sshll.u32 %s938_s15, 2  ;;  %vm242_vm0 = vcmask 27648   ;;  %v771_v2 = vmov 0.0   ;;  %vm249_vm1 = vcmask 1043456   ;;  %v244_v4 = vld [vmem:[%s198_s6] sm:$0xff] }
  0x59   : > { %s955_s30 = scalar_lea.vmem [#allocation7], %s531_s19  ;;  %v245_v5 = vld [vmem:[%s207_s16] sm:$0x3]  ;;  %v247_v7 = vcombine.high %v244_v4, %v244_v4  ;;  %v250_v8 = vsel %vm249_vm1, %v244_v4, -inf  ;;  %v772_v14 = vmov 839922192   ;;  %vm271_vm4 = vcmp.ne.f32.partialorder %v244_v4, %v244_v4 }
  0x5a   : > { %v953_v1 = vshrl.u32 %v264_v0, 7  ;;  %243 = vst.msk [vmem:[%s955_s30] sm:$0xf] %vm242_vm0, %v771_v2  ;;  %v251_v9 = vrot.slane %v250_v8, 4  ;;  %v274_v15 = vunpack.c.l.s4 %v772_v14  ;;  %v773_v22 = vmov 1.0|1.0  }
  0x5b   : > { %v257_v11 = vsel %vm249_vm1, %v247_v7, -inf  ;;  %s545_s21 = sshll.u32 %s759_s12, 6  ;;  %s405_s20 = sshll.u32 %s955_s30, 4  ;;  %s979_s20 = int_to_ptr.vmem [resolvable:$true] %s405_s20 }
  0x5c   : > { %v318_v3 = vsub.s32 1, %v953_v1  ;;  %v314_v6 = vsub.s32 0, %v953_v1  ;;  %v252_v12 = vmax.f32 %v250_v8, %v251_v9  ;;  %v258_v13 = vrot.slane %v257_v11, 4  ;;  %s977_s28 = scalar_lea.hbm %s1030_s2, %s545_s21  ;;  %s391_s25 = scalar_lea.sflag [#allocation4], %s938_s15 }
  0x5d   : > { %v275_v21 = vunpack.c.0.s8 %v274_v15  ;;  %s681_s12 = scalar_lea.vmem %s979_s20, 64  ;;  %p1043_p0 = scmp.ne.s32.totalorder %s1035_s22, 0 }
  0x5e   : > { %v319_v10 = vrot.slane %v245_v5, %v318_v3  ;;  %v253_v17 = vrot.slane %v252_v12, 2  ;;  %v259_v18 = vmax.f32 %v257_v11, %v258_v13  ;;  %v315_v45 = vrot.slane %v245_v5, %v314_v6  ;;  %p682_p8 = scmp.ne.s32.totalorder %s979_s20, %s681_s12  ;;  %s774_s3 = smov [#allocation7]  }
  0x5f   : > { %v278_v27 = vsub.s32 %v275_v21, %v953_v1  ;;  %s685_s7 = sshll.u32 %s774_s3, 4  ;;  %s686_s7 = int_to_ptr.vmem [resolvable:$false] %s685_s7 }
  0x60   : > { %v337_v16 = vrot.slane %v319_v10, %v314_v6  ;;  %v254_v19 = vmax.f32 %v252_v12, %v253_v17  ;;  %v260_v20 = vrot.slane %v259_v18, 2  ;;  %v333_v48 = vrot.slane %v315_v45, %v314_v6  ;;  %p683_p7 = pnand %p682_p8, %p1043_p0  ;;  %s687_s8 = scalar_lea.vmem %s686_s7, 128 }
  0x61   : > { %v279_v30 = vrot.slane %v953_v1, %v278_v27  ;;  %v346_v49 = vld [vmem:[%s955_s30] sm:$0xf]  ;;  %p688_p10 = scmp.lt.s32.totalorder %s979_s20, %s686_s7  ;;  %p689_p12 = scmp.lt.s32.totalorder %s687_s8, %s681_s12 }
  0x62   : > { %vm339_vm2 = vcmp.eq.s32.totalorder %v337_v16, %v953_v1  ;;  %v255_v23 = vrot.slane %v254_v19, 1  ;;  %v261_v24 = vmax.f32 %v259_v18, %v260_v20  ;;  %p684_p4 = pneg %p683_p7 }
  0x63   : > { %vm540_vm3 = vmpackc.low %vm339_vm2, %vm339_vm2  ;;  %vm338_vm2 = vcmp.eq.s32.totalorder %v333_v48, %v953_v1  ;;  %p690_p1 = por %p689_p12, %p688_p10 }
  0x64   : > { %541 = vmatprep.mubr.msk.bf16.mxu0 %vm540_vm3, %v773_v22  ;;  %v256_v25 = vmax.f32 %v254_v19, %v255_v23  ;;  %v262_v26 = vrot.slane %v261_v24, 1  ;;  %vm542_vm3 = vmpackc.low %vm338_vm2, %vm338_vm2 }
  0x65   : > { %p691_p2 = pnand %p690_p1, %p684_p4 }
  0x66   : > { %v263_v28 = vmax.f32 %v261_v24, %v262_v26 }
  0x68   : > { %v268_v29 = vcombine.low %v256_v25, %v263_v28 }
  0x6a   : > { %vm270_vm5 = vcmp.eq.f32.partialorder %v244_v4, %v268_v29 }
  0x6b   : > { %vm272_vm6 = vmor %vm270_vm5, %vm271_vm4 }
  0x6c   : > { %v280_v31 = vsel %vm272_vm6, %v279_v30, 4 }
  0x6d   : > { %v281_v32 = vcombine.high %v280_v31, %v280_v31  ;;  %v282_v33 = vsel %vm249_vm1, %v280_v31, 2147483647 }
  0x6e   : > { %v283_v34 = vrot.slane %v282_v33, 4 }
  0x6f   : > { %v292_v35 = vsel %vm249_vm1, %v281_v32, 2147483647 }
  0x70   : > { %v293_v36 = vrot.slane %v292_v35, 4  ;;  %vm284_vm7 = vcmp.lt.s32.totalorder %v282_v33, %v283_v34 }
  0x71   : > { %v285_v37 = vsel %vm284_vm7, %v282_v33, %v283_v34 }
  0x72   : > { %vm294_vm8 = vcmp.lt.s32.totalorder %v292_v35, %v293_v36  ;;  %v286_v38 = vrot.slane %v285_v37, 2 }
  0x73   : > { %v295_v39 = vsel %vm294_vm8, %v292_v35, %v293_v36 }
  0x74   : > { %v296_v40 = vrot.slane %v295_v39, 2  ;;  %vm287_vm9 = vcmp.lt.s32.totalorder %v285_v37, %v286_v38 }
  0x75   : > { %v288_v41 = vsel %vm287_vm9, %v285_v37, %v286_v38 }
  0x76   : > { %vm297_vm10 = vcmp.lt.s32.totalorder %v295_v39, %v296_v40  ;;  %v289_v42 = vrot.slane %v288_v41, 1 }
  0x77   : > { %v298_v43 = vsel %vm297_vm10, %v295_v39, %v296_v40 }
  0x78   : > { %v299_v44 = vrot.slane %v298_v43, 1  ;;  %vm290_vm11 = vcmp.lt.s32.totalorder %v288_v41, %v289_v42 }
  0x79   : > { %v291_v46 = vsel %vm290_vm11, %v288_v41, %v289_v42 }
  0x7a   : > { %vm300_vm12 = vcmp.lt.s32.totalorder %v298_v43, %v299_v44  ;;  %vm322_vm13 = vcmp.eq.s32.totalorder %v291_v46, %v953_v1 }
  0x7b   : > { %v301_v47 = vsel %vm300_vm12, %v298_v43, %v299_v44  ;;  %vm538_vm15 = vmpackc.low %vm322_vm13, %vm322_vm13 }
  0x7c   : > { %vm323_vm14 = vcmp.eq.s32.totalorder %v301_v47, %v953_v1 }
  0x7d   : > { %vm536_vm1 = vmpackc.low %vm323_vm14, %vm323_vm14 }
  0x7e   : > { %537 = vmatprep.subr.msk.bf16.mxu0 %vm536_vm1, %v773_v22 }
  0x7f   : > { %539 = vmatpush1.bf16.xpose.msk.msra.mxu0 %vm538_vm15, %v773_v22 }
  0x86   : > { %543 = vmatmul.mubr.msk.bf16.vlgmr.msra.gmra.mrb[0].mxu0 %vm542_vm3, %v773_v22 }
 0x159   : > { %v381_v50 = vpop.f32.mrb[0].mxu0 }
 0x15a   : > { %v387_v51 = vadd.f32 %v381_v50, %v346_v49  ;;  %v383_v52 = vpop.f32.mrb[1].mxu0 }
 0x15b   : > { %v384_v53 = vpop.f32.mrb[2].mxu0 }
 0x15c   : > { %389 = vst.msk [vmem:[%s955_s30] sm:$0xf] %vm242_vm0, %v387_v51  ;;  %v385_v54 = vpop.f32.mrb[3].mxu0 }
 0x15d   : > { %694 = shalt.err (!%p691_p2)
}
 0x15e   : > { %s695_s15 = scalar_lea.hbm %s977_s28, 64  ;;  %s699_s6 = scalar_lea.hbm %s1030_s2, 128 }
 0x15f   : > { %p696_p9 = scmp.ne.s32.totalorder %s977_s28, %s695_s15  ;;  %p700_p6 = scmp.lt.u32.totalorder %s977_s28, %s1030_s2 }
 0x160   : > { %p701_p13 = scmp.lt.u32.totalorder %s699_s6, %s695_s15  ;;  %p703_p8 = scmp.lt.u32.totalorder %s695_s15, %s977_s28 }
 0x161   : > { %p697_p11 = pnand %p696_p9, %p1043_p0 }
 0x162   : > { %p702_p5 = por %p701_p13, %p700_p6 }
 0x163   : > { %p698_p3 = pneg %p697_p11 }
 0x164   : > { %p704_p7 = por %p703_p8, %p702_p5 }
 0x166   : > { %p705_p4 = pnand %p704_p7, %p698_p3 }
 0x168   : > { %708 = shalt.err (!%p705_p4)
}
 0x169   : > { %554 = dma.vmem_to_hbm [thread:$0]  (%p1043_p0), %s979_s20, 64, %s977_s28, %s391_s25  }
 0x16a PF: > { %s417_s16 = sand.u32 1, %s747_s9   ;;  %p1044_p10 = scmp.ne.s32.totalorder %s1036_s24, 0 }
 0x16b   : > { %p1045_p12 = scmp.ge.s32.totalorder %s767_s14, 2  ;;  %s418_s19 = scalar_lea.sflag [#allocation4], %s417_s16 }
 0x16d   : > { %p564_p1 = pnand %p1045_p12, %p1044_p10 }
 0x16f   : > { %742 = dma.done.wait (!%p564_p1), %s418_s19, 64  }
 0x170   : > { %744 = vsyncadd (!%p564_p1), %s418_s19, 4294967232  ;;  %s21_s14 = sadd.s32 1, %s767_s14   ;;  %s1046_s9 = smov %s751_s10 }
 0x171   : > { %p18_p2 = scmp.ge.s32.totalorder %s21_s14, 4   ;;  %s1047_s10 = smov %s755_s11 }
 0x172   : > { %s1048_s11 = smov %s846_s23  ;;  %s1049_s12 = smov %s763_s13 }
 0x173   : > { %s1050_s13 = smov %s1052_s17  ;;  %20 = sbr.rel (!%p18_p2) target bundleno = 8 (0x8), region = 90 }
 0x17a   :  { %423 = vsyncpa [#allocation3], 1 }
 0x17b   :  { %425 = vsyncpa [#allocation3 + $0x1], 1 }
 0x17c   :  { %426 = vsyncpa [#allocation6], 1 }
 0x17d   :  { %428 = vsyncpa [#allocation6 + $0x1], 1 }
 0x17e   :  { %429 = vsyncpa [#allocation4], 1 }
 0x17f   :  { %431 = vsyncpa [#allocation4 + $0x1], 1 }

</bundles_post_ra>
